<compile_context>
chip_gen: v5e
topology: v5e:2x2
jax: 0.10.0
libtpu: 0.0.40
codegen_flags: <defaults>
</compile_context>

<pallas_src>
import jax
import jax.numpy as jnp
from jax import lax
from jax.experimental import pallas as pl
from jax.experimental.pallas import tpu as pltpu

_EPS = 1e-12          # matches torch.nn.functional.normalize default eps
_LANES = 128
_SUBLANES = 8
_MAX_TM = 4096        # fat-tile cap for tiny D (per-step-overhead bound regime)


def _round_up(v, m):
    return (v + m - 1) // m * m


def _round_down(v, m):
    return (v // m) * m


def _vmem_capacity_bytes():
    """Physical per-core VMEM; falls back to the smallest (v7x: 64 MiB)."""
    try:
        return int(pltpu.get_tpu_info().vmem_capacity_bytes)
    except Exception:
        return 64 << 20


def _gmoe_gate_kernel(x_ref, wn_ref, gb_ref, o_ref):
    # x_ref : (tm, D)      tile of tokens (boundary block may hold garbage rows;
    #                      every op below is row-wise so they stay isolated and
    #                      their writes are dropped by Pallas)
    # wn_ref: (D, E_pad)   pre-normalized sim_matrix slice, zero-padded to 128 lanes
    # gb_ref: (1, E)       precomputed sigmoid(gates[:E])
    # o_ref : (tm, E)
    x = x_ref[...].astype(jnp.float32)  # no-op for f32 inputs

    # F.normalize(x, dim=1): x / max(||x||, eps) == x * rsqrt(max(||x||^2, eps^2))
    sumsq = jnp.sum(x * x, axis=1, keepdims=True)
    x_norm = x * lax.rsqrt(jnp.maximum(sumsq, _EPS * _EPS))

    logits = jnp.dot(x_norm.astype(wn_ref.dtype), wn_ref[...],
                     preferred_element_type=jnp.float32)
    e = o_ref.shape[1]                          # static
    logits = jax.nn.sigmoid(logits[:, :e])      # drop lane-padded expert columns
    o_ref[...] = jnp.maximum(
        logits - gb_ref[...].astype(jnp.float32), 0.0).astype(o_ref.dtype)


def gmoe_gate_prepare(sim_matrix, gates, expert_num, *,
                      matmul_dtype=jnp.float32):
    """Per-parameter-set precompute (do once, not per forward call).

    Returns (w_norm, gate_bias):
      w_norm   : (D, E_pad)  column-normalized active experts, 128-lane padded
      gate_bias: (1, E)      sigmoid(gates[:E])
    """
    e = expert_num
    e_pad = _round_up(e, _LANES)
    w = sim_matrix[:, :e].astype(jnp.float32)
    w_sumsq = jnp.sum(w * w, axis=0, keepdims=True)
    w_norm = (w * lax.rsqrt(jnp.maximum(w_sumsq, _EPS * _EPS))).astype(matmul_dtype)
    w_norm = jnp.pad(w_norm, ((0, 0), (0, e_pad - e)))           # (D, E_pad)
    gate_bias = jax.nn.sigmoid(gates[:e].astype(jnp.float32)).reshape(1, e)
    return w_norm, gate_bias


def gmoe_gate_apply(x, w_norm, gate_bias, *, tm=None):
    """x: (N, D); w_norm: (D, E_pad); gate_bias: (1, E) -> (N, E)."""
    n, d = x.shape
    d_w, e_pad = w_norm.shape
    assert d_w == d
    e = gate_bias.shape[1]

    itemsize_x = jnp.dtype(x.dtype).itemsize
    itemsize_w = jnp.dtype(w_norm.dtype).itemsize
    itemsize_o = itemsize_x

    # --- Generation-aware VMEM budget (v5e/v6e: 128 MiB, v7x: 64 MiB) --------
    budget = int(0.75 * _vmem_capacity_bytes())
    # Block-invariant inputs still get double-buffered by the pipeline; count 2x.
    resident = 2 * d * e_pad * itemsize_w + 2 * _SUBLANES * _LANES * 4
    per_row = 2 * d * itemsize_x + 2 * e_pad * itemsize_o   # x + out, double-buffered

    if tm is None:
        tm = max(_SUBLANES, (budget - resident) // max(per_row, 1))
    tm_eff = _round_down(int(tm), _SUBLANES)
    tm_eff = max(_SUBLANES, min(tm_eff, _MAX_TM, _round_up(n, _SUBLANES)))

    needed = resident + tm_eff * per_row
    vmem_limit = min(budget, max(int(needed * 1.25), 32 << 20))

    grid = (pl.cdiv(n, tm_eff),)   # ragged last block handled by Pallas masking

    return pl.pallas_call(
        _gmoe_gate_kernel,
        out_shape=jax.ShapeDtypeStruct((n, e), x.dtype),
        grid=grid,
        in_specs=[
            pl.BlockSpec((tm_eff, d), lambda i: (i, 0)),   # x tile
            pl.BlockSpec((d, e_pad), lambda i: (0, 0)),    # pre-normalized W (block-invariant)
            pl.BlockSpec((1, e), lambda i: (0, 0)),        # sigmoid(gates)
        ],
        out_specs=pl.BlockSpec((tm_eff, e), lambda i: (i, 0)),
        compiler_params=pltpu.CompilerParams(
            dimension_semantics=("parallel",),
            vmem_limit_bytes=int(vmem_limit)),
    )(x, w_norm, gate_bias)


def gmoe_gate(x, sim_matrix, gates, expert_num, *, tm=None,
              matmul_dtype=jnp.float32):
    """Convenience wrapper: prepare params + apply.

    For repeated forwards with fixed parameters, call gmoe_gate_prepare once
    and reuse its outputs with gmoe_gate_apply.  On v6e/v7x, matmul_dtype may
    be jnp.bfloat16 to halve W traffic/footprint (f32 accumulation kept).
    """
    w_norm, gate_bias = gmoe_gate_prepare(
        sim_matrix, gates, expert_num, matmul_dtype=matmul_dtype)
    return gmoe_gate_apply(x, w_norm, gate_bias, tm=tm)


def gmoe_gate_ref(x, sim_matrix, gates, expert_num):
    """Pure-JAX reference mirroring the PyTorch forward."""
    w = sim_matrix[:, :expert_num]
    xn = x / jnp.maximum(jnp.linalg.norm(x, axis=1, keepdims=True), _EPS)
    wn = w / jnp.maximum(jnp.linalg.norm(w, axis=0, keepdims=True), _EPS)
    logits = jax.nn.sigmoid(xn @ wn)
    g = jax.nn.sigmoid(gates[:expert_num])
    return jax.nn.relu(logits - g[None, :])


if __name__ == "__main__":
    # Small deterministic setup consistent with the module:
    #   expert_num=8, model_dim=32, max_expert_num=64, N=16 tokens.
    expert_num = 8
    model_dim = 32
    max_expert_num = 64
    n_tokens = 16

    key = jax.random.PRNGKey(0)
    kx, kw = jax.random.split(key)
    x = jax.random.normal(kx, (n_tokens, model_dim), dtype=jnp.float32)
    # Parameters (deterministic, in-script): sim_matrix ~ randn, gates = zeros
    sim_matrix = jax.random.normal(kw, (model_dim, max_expert_num),
                                   dtype=jnp.float32)
    gates = jnp.zeros((max_expert_num,), dtype=jnp.float32)

    out = gmoe_gate(x, sim_matrix, gates, expert_num)
    out = jax.block_until_ready(out)

    ref = gmoe_gate_ref(x, sim_matrix, gates, expert_num)
    assert out.shape == (n_tokens, expert_num)
    assert jnp.allclose(out, ref, atol=1e-5, rtol=1e-5)

    # Multi-tile + ragged last block (1000 tokens, tm=256 -> 4 blocks, last ragged).
    n2 = 1000
    x2 = jax.random.normal(jax.random.PRNGKey(2), (n2, model_dim), jnp.float32)
    out2 = jax.block_until_ready(
        gmoe_gate(x2, sim_matrix, gates, expert_num, tm=256))
    ref2 = gmoe_gate_ref(x2, sim_matrix, gates, expert_num)
    assert out2.shape == (n2, expert_num)
    assert jnp.allclose(out2, ref2, atol=1e-5, rtol=1e-5)

    print("KERNEL_OK")
</pallas_src>

<mosaic_0001>
module attributes {stable_mosaic.version = 11 : i64} {
  func.func @_gmoe_gate_kernel(%arg0: i32, %arg1: memref<16x32xf32, #tpu.memory_space<vmem>>, %arg2: memref<32x128xf32, #tpu.memory_space<vmem>>, %arg3: memref<1x8xf32, #tpu.memory_space<vmem>>, %arg4: memref<16x8xf32, #tpu.memory_space<vmem>>) attributes {dimension_semantics = [#tpu.dimension_semantics<parallel>], iteration_bounds = array<i64: 1>, scalar_prefetch = 0 : i64, scratch_operands = 0 : i64, tpu.core_type = #tpu.core_type<tc>, window_params = [{transform_indices = @transform_0, window_bounds = array<i64: 16, 32>}, {pipeline_mode = #tpu.pipeline_mode<synchronous>, transform_indices = @transform_1, window_bounds = array<i64: 32, 128>}, {pipeline_mode = #tpu.pipeline_mode<synchronous>, transform_indices = @transform_2, window_bounds = array<i64: 1, 8>}, {transform_indices = @transform_3, window_bounds = array<i64: 16, 8>}]} {
    %c0 = arith.constant 0 : index
    %c0_0 = arith.constant 0 : index
    %0 = vector.load %arg1[%c0, %c0_0] : memref<16x32xf32, #tpu.memory_space<vmem>>, vector<16x32xf32>
    %1 = arith.mulf %0, %0 : vector<16x32xf32>
    %cst = arith.constant dense<0.000000e+00> : vector<16xf32>
    %2 = vector.multi_reduction <add>, %1, %cst [1] : vector<16x32xf32> to vector<16xf32>
    %3 = vector.shape_cast %2 : vector<16xf32> to vector<16x1xf32>
    %cst_1 = arith.constant 1.000000e-24 : f32
    %4 = vector.broadcast %cst_1 : f32 to vector<16x1xf32>
    %5 = arith.maximumf %3, %4 : vector<16x1xf32>
    %6 = math.rsqrt %5 : vector<16x1xf32>
    %7 = vector.broadcast %6 : vector<16x1xf32> to vector<16x32xf32>
    %8 = arith.mulf %0, %7 : vector<16x32xf32>
    %c0_2 = arith.constant 0 : index
    %c0_3 = arith.constant 0 : index
    %9 = vector.load %arg2[%c0_2, %c0_3] : memref<32x128xf32, #tpu.memory_space<vmem>>, vector<32x128xf32>
    %cst_4 = arith.constant dense<0.000000e+00> : vector<16x128xf32>
    %10 = tpu.matmul %8, %9, %cst_4 {dimension_numbers = #tpu.dot_dimension_numbers<[1], [0], [0], [1], [0, 0, 1, 1], [], []>} : vector<16x32xf32>, vector<32x128xf32>, vector<16x128xf32> -> vector<16x128xf32>
    %11 = vector.extract_strided_slice %10 {offsets = [0, 0], sizes = [16, 8], strides = [1, 1]} : vector<16x128xf32> to vector<16x8xf32>
    %12 = arith.negf %11 : vector<16x8xf32>
    %13 = math.exp %12 : vector<16x8xf32>
    %cst_5 = arith.constant 1.000000e+00 : f32
    %14 = vector.broadcast %cst_5 : f32 to vector<16x8xf32>
    %15 = arith.addf %14, %13 : vector<16x8xf32>
    %16 = arith.divf %14, %15 : vector<16x8xf32>
    %c0_6 = arith.constant 0 : index
    %c0_7 = arith.constant 0 : index
    %17 = vector.load %arg3[%c0_6, %c0_7] : memref<1x8xf32, #tpu.memory_space<vmem>>, vector<1x8xf32>
    %18 = vector.broadcast %17 : vector<1x8xf32> to vector<16x8xf32>
    %19 = arith.subf %16, %18 : vector<16x8xf32>
    %cst_8 = arith.constant 0.000000e+00 : f32
    %20 = vector.broadcast %cst_8 : f32 to vector<16x8xf32>
    %21 = arith.maximumf %19, %20 : vector<16x8xf32>
    %c0_9 = arith.constant 0 : index
    %c0_10 = arith.constant 0 : index
    %22 = vector.load %arg4[%c0_9, %c0_10] : memref<16x8xf32, #tpu.memory_space<vmem>>, vector<16x8xf32>
    tpu.vector_store %arg4[%c0_9, %c0_10], %21 {strides = array<i32>} : memref<16x8xf32, #tpu.memory_space<vmem>>, vector<16x8xf32>,
    return
  }
  func.func @transform_0(%arg0: i32) -> (i32, i32) {
    %c0_i32 = arith.constant 0 : i32
    %c0_i32_0 = arith.constant 0 : i32
    return %arg0, %c0_i32 : i32, i32
  }
  func.func @transform_1(%arg0: i32) -> (i32, i32) {
    %c0_i32 = arith.constant 0 : i32
    %c0_i32_0 = arith.constant 0 : i32
    %c0_i32_1 = arith.constant 0 : i32
    return %c0_i32, %c0_i32_0 : i32, i32
  }
  func.func @transform_2(%arg0: i32) -> (i32, i32) {
    %c0_i32 = arith.constant 0 : i32
    %c0_i32_0 = arith.constant 0 : i32
    %c0_i32_1 = arith.constant 0 : i32
    return %c0_i32, %c0_i32_0 : i32, i32
  }
  func.func @transform_3(%arg0: i32) -> (i32, i32) {
    %c0_i32 = arith.constant 0 : i32
    %c0_i32_0 = arith.constant 0 : i32
    return %arg0, %c0_i32 : i32, i32
  }
}

</mosaic_0001>

<bundles_post_ra>
// kernel: tpu_custom_call.1
= control target key start
LH: loop header
LB: loop body
LE: loop exit
PB: predicated region body
PF: predicated region fallthrough
CT: control target
= control target key end

     0   :  { %8 = vsyncpa [#allocation3], 0  ;;  %s291_s0 = inlined_call_operand.hbm [shape: f32[16,32], index: 0, kind: input, shape index: {}]   ;;  %s292_s1 = inlined_call_operand.hbm [shape: f32[32,128], index: 1, kind: input, shape index: {}]   ;;  %s293_s2 = inlined_call_operand.vmem [shape: f32[1,8], index: 2, kind: input, shape index: {}]   ;;  %s294_s3 = inlined_call_operand.vmem [shape: f32[16,8], index: 3, kind: output, shape index: {}]  }
   0x1   :  { %s14_s14 = sshll.u32 %s291_s0, 4  ;;  %s15_s14 = int_to_ptr.hbm [resolvable:$true] %s14_s14 }
   0x2   :  { %9 = vsyncpa [#allocation5], 0  ;;  %s246_s15 = smov [#allocation2]   ;;  %s27_s19 = sshll.u32 %s292_s1, 4  ;;  %s28_s19 = int_to_ptr.hbm [resolvable:$true] %s27_s19 }
   0x3   :  { %s16_s16 = sshll.u32 %s246_s15, 4  ;;  %s247_s20 = smov 128   ;;  %s17_s16 = int_to_ptr.vmem [resolvable:$true] %s16_s16 }
   0x4   :  { %s248_s21 = smov 8   ;;  %s249_s22 = smov [#allocation4]  }
   0x5   :  { %22 = dma.hbm_to_vmem [thread:$0]  %s15_s14, 256, %s17_s16, [#allocation3], %s247_s20, %s247_s20, %s248_s21  }
   0x6   :  { %s29_s23 = sshll.u32 %s249_s22, 4  ;;  %s30_s23 = int_to_ptr.vmem [resolvable:$true] %s29_s23 }
   0x7   :  { %35 = dma.hbm_to_vmem [thread:$0]  %s28_s19, 512, %s30_s23, [#allocation5], %s247_s20, %s247_s20, %s248_s21  }
   0x8   :  { %242 = dma.done.wait [#allocation3], 256  }
   0x9   :  { %243 = vsyncadd [#allocation3], 4294967040 }
   0xa   :  { %244 = dma.done.wait [#allocation5], 512  }
   0xb   :  { %245 = vsyncadd [#allocation5], 4294966784  ;;  %v46_v0 = vld [vmem:[#allocation2] sm:$0xff]  ;;  %vm50_vm0 = vcmask 261120   ;;  %v47_v2 = vld [vmem:[#allocation2 + $0x8] sm:$0xff]  ;;  %vm160_vm11 = vcmask 64512  }
   0xc   :  { %v48_v1 = vmul.f32 %v46_v0, %v46_v0  ;;  %v49_v4 = vmul.f32 %v47_v2, %v47_v2  ;;  %v84_v6 = vld [vmem:[#allocation4 + $0x18] sm:$0xff]  ;;  %v83_v7 = vld [vmem:[#allocation4 + $0x10] sm:$0xff]  ;;  %v82_v8 = vld [vmem:[#allocation4 + $0x8] sm:$0xff] }
   0xd   :  { %103 = vmatpush.msra.mxu0 %v84_v6  ;;  %173 = vmatpush.msra.mxu1 %v84_v6  ;;  %v81_v9 = vld [vmem:[#allocation4] sm:$0xff]  ;;  %v181_v45 = vld [vmem:[%s293_s2] ss:$0 sm:$0xff] }
   0xe   :  { %v51_v3 = vsel %vm50_vm0, %v48_v1, 0.0  ;;  %v54_v5 = vsel %vm50_vm0, %v49_v4, 0.0 }
   0xf   :  { %52 = vadd.xlane.f32.xlu0 %v51_v3  ;;  %104 = vmatpush.msra.mxu0 %v83_v7 }
  0x10   :  { %174 = vmatpush.msra.mxu1 %v83_v7 }
  0x11   :  { %105 = vmatpush.msra.mxu0 %v82_v8 }
  0x12   :  { %175 = vmatpush.msra.mxu1 %v82_v8 }
  0x13   :  { %106 = vmatpush.msra.mxu0 %v81_v9 }
  0x14   :  { %176 = vmatpush.msra.mxu1 %v81_v9 }
  0x17   :  { %55 = vadd.xlane.f32.xlu0 %v54_v5 }
  0x82   :  { %v53_v10 = vpop.xlane.xlu0 %52 }
  0x83   :  { %v57_v11 = vmax.f32 %v53_v10, 1e-24 }
  0x85   :  { %182 = vrsqrt.f32 %v57_v11  ;;  %vm65_vm2 = vweird.f32 %v57_v11 }
  0x8a   :  { %v56_v12 = vpop.xlane.xlu0 %55 }
  0x8b   :  { %v183_v13 = vpop.eup %182  ;;  %v58_v14 = vmax.f32 %v56_v12, 1e-24 }
  0x8c   :  { %v60_v15 = vmul.f32 %v183_v13, %v57_v11  ;;  %vm66_vm1 = vweird.f32 %v183_v13 }
  0x8d   :  { %184 = vrsqrt.f32 %v58_v14  ;;  %vm67_vm3 = vmor %vm65_vm2, %vm66_vm1  ;;  %vm75_vm5 = vweird.f32 %v58_v14 }
  0x8e   :  { %v61_v16 = vmul.f32 %v183_v13, %v60_v15 }
  0x90   :  { %v62_v17 = vmul.f32 0.5, %v61_v16 }
  0x92   :  { %v63_v18 = vsub.f32 1.5, %v62_v17 }
  0x93   :  { %v185_v19 = vpop.eup %184 }
  0x94   :  { %v70_v20 = vmul.f32 %v185_v19, %v58_v14  ;;  %v64_v21 = vmul.f32 %v183_v13, %v63_v18  ;;  %vm76_vm4 = vweird.f32 %v185_v19 }
  0x95   :  { %vm77_vm6 = vmor %vm75_vm5, %vm76_vm4 }
  0x96   :  { %v71_v22 = vmul.f32 %v185_v19, %v70_v20  ;;  %v68_v23 = vsel %vm67_vm3, %v183_v13, %v64_v21 }
  0x97   :  { %v79_v24 = vmul.f32 %v68_v23, %v46_v0 }
  0x98   :  { %v72_v25 = vmul.f32 0.5, %v71_v22 }
  0x99   :  { %169 = vmatmul.msk.f32.vlgmr.msra.gmra.mxu0 %vm50_vm0, %v79_v24 }
  0x9a   :  { %v73_v26 = vsub.f32 1.5, %v72_v25 }
  0x9c   :  { %v74_v27 = vmul.f32 %v185_v19, %v73_v26 }
  0x9e   :  { %v78_v28 = vsel %vm77_vm6, %v185_v19, %v74_v27 }
  0x9f   :  { %v80_v29 = vmul.f32 %v78_v28, %v47_v2 }
  0xa1   :  { %170 = vmatmul.msk.f32.vlgmr.msra.gmra.mxu1 %vm50_vm0, %v80_v29 }
 0x116   :  { %v108_v30 = vpop.f32.mrf.mxu0 }
 0x117   :  { %v171_v31 = vmul.f32 -1.442695, %v108_v30 }
 0x119   :  { %186 = vpow2.f32 %v171_v31 }
 0x11e   :  { %v111_v32 = vpop.f32.mrf.mxu1 }
 0x11f   :  { %v187_v33 = vpop.eup %186  ;;  %v172_v34 = vmul.f32 -1.442695, %v111_v32 }
 0x120   :  { %v120_v35 = vadd.f32 1.0, %v187_v33 }
 0x121   :  { %188 = vpow2.f32 %v172_v34 }
 0x122   :  { %190 = vrcp.f32 %v120_v35  ;;  %v133_v41 = vand.u32 2147483648, %v120_v35  ;;  %v131_v43 = vand.u32 2147483647, %v120_v35  ;;  %vm127_vm8 = vweird.f32 %v120_v35 }
 0x124   :  { %v134_v47 = vor.u32 1.1754944e-38, %v133_v41  ;;  %vm132_vm10 = vcmp.eq.f32.partialorder %v131_v43, 8.507059e+37 }
 0x127   :  { %v189_v36 = vpop.eup %188 }
 0x128   :  { %v191_v37 = vpop.eup %190  ;;  %v121_v38 = vadd.f32 1.0, %v189_v36 }
 0x129   :  { %v123_v39 = vmul.f32 %v191_v37, %v120_v35  ;;  %vm128_vm7 = vweird.f32 %v191_v37 }
 0x12a   :  { %192 = vrcp.f32 %v121_v38  ;;  %vm129_vm9 = vmor %vm127_vm8, %vm128_vm7  ;;  %v148_v53 = vand.u32 2147483648, %v121_v38  ;;  %v146_v56 = vand.u32 2147483647, %v121_v38  ;;  %vm142_vm13 = vweird.f32 %v121_v38 }
 0x12b   :  { %v124_v40 = vsub.f32 1.0, %v123_v39 }
 0x12c   :  { %v149_v58 = vor.u32 1.1754944e-38, %v148_v53  ;;  %vm147_vm15 = vcmp.eq.f32.partialorder %v146_v56, 8.507059e+37 }
 0x12d   :  { %v125_v42 = vmul.f32 %v191_v37, %v124_v40 }
 0x12f   :  { %v126_v44 = vadd.f32 %v191_v37, %v125_v42 }
 0x130   :  { %v193_v46 = vpop.eup %192 }
 0x131   :  { %v130_v48 = vsel %vm129_vm9, %v191_v37, %v126_v44  ;;  %v138_v49 = vmul.f32 %v193_v46, %v121_v38  ;;  %vm143_vm12 = vweird.f32 %v193_v46 }
 0x132   :  { %v135_v50 = vsel %vm132_vm10, %v134_v47, %v130_v48  ;;  %vm144_vm14 = vmor %vm142_vm13, %vm143_vm12 }
 0x133   :  { %v156_v51 = vsub.f32 %v135_v50, %v181_v45  ;;  %v139_v52 = vsub.f32 1.0, %v138_v49 }
 0x135   :  { %v158_v54 = vmax.f32 %v156_v51, 0.0  ;;  %v140_v55 = vmul.f32 %v193_v46, %v139_v52 }
 0x137   :  { %161 = vst.msk [vmem:[%s294_s3] sm:$0xff] %vm160_vm11, %v158_v54  ;;  %v141_v57 = vadd.f32 %v193_v46, %v140_v55 }
 0x139   :  { %v145_v59 = vsel %vm144_vm14, %v193_v46, %v141_v57 }
 0x13a   :  { %v150_v60 = vsel %vm147_vm15, %v149_v58, %v145_v59 }
 0x13b   :  { %v157_v61 = vsub.f32 %v150_v60, %v181_v45 }
 0x13d   :  { %v159_v62 = vmax.f32 %v157_v61, 0.0 }
 0x13f   :  { %162 = vst.msk [vmem:[%s294_s3 + $0x8] sm:$0xff] %vm160_vm11, %v159_v62 }
 0x140   :  { %167 = vsyncpa [#allocation3], 1 }
 0x141   :  { %168 = vsyncpa [#allocation5], 1 }

</bundles_post_ra>
